<compile_context>
chip_gen: v5e
topology: v5e:2x2
jax: 0.10.0
libtpu: 0.0.40
codegen_flags: <defaults>
</compile_context>

<pallas_src>
import functools

import jax
import jax.numpy as jnp
from jax.experimental import pallas as pl
from jax.experimental.pallas import tpu as pltpu

_LANE = 128
_MIB = 1024 * 1024


def _round_up(x, m):
    return (x + m - 1) // m * m


def _sublane(dtype):
    # Min sublane tile: 8 for 32-bit, 16 for bf16/fp16, 32 for int8/fp8.
    return max(8, 32 // jnp.dtype(dtype).itemsize)


@functools.lru_cache(maxsize=None)
def _vmem_budget_and_limit():
    """Generation-aware (tile-footprint budget, compiler vmem limit) in bytes."""
    cap = None
    try:
        cap = int(pltpu.get_tpu_info().vmem_capacity_bytes)
    except Exception:
        cap = None
    if cap is not None and cap >= 100 * _MIB:
        # v5e / v6e: 128 MiB physical VMEM per TensorCore.
        return 64 * _MIB, 96 * _MIB
    # v7x (64 MiB per TC) or unknown generation: stay conservative.
    return 40 * _MIB, 48 * _MIB


def _fc_kernel_acc(x_ref, w_ref, b_ref, o_ref, acc_ref):
    """One (tm, tn) output tile; grid axis 2 is the K reduction."""
    k = pl.program_id(2)
    prod = jnp.dot(x_ref[...], w_ref[...], preferred_element_type=jnp.float32)

    @pl.when(k == 0)
    def _():
        # First K step: store directly (no zero-init + add round trip).
        acc_ref[...] = prod

    @pl.when(k != 0)
    def _():
        acc_ref[...] += prod

    @pl.when(k == pl.num_programs(2) - 1)
    def _():
        # Bias fused here: applied exactly once, after the full K reduction.
        o_ref[...] = (acc_ref[...] + b_ref[...]).astype(o_ref.dtype)


def _fc_kernel_single_k(x_ref, w_ref, b_ref, o_ref):
    """Whole K fits in one tile: no accumulator scratch, no predicates."""
    o_ref[...] = (
        jnp.dot(x_ref[...], w_ref[...], preferred_element_type=jnp.float32)
        + b_ref[...]
    ).astype(o_ref.dtype)


def _pick_tiles(m_pad, k_pad, n_pad, itemsize, sublane, budget):
    """Largest MXU-friendly tiles whose pipelined blocks fit the VMEM budget."""
    tm = min(m_pad, 512)    # multiple of `sublane` (m_pad is)
    tn = min(n_pad, 1024)   # multiple of 128 (n_pad is)
    tk = min(k_pad, 1024)   # multiple of 128 (k_pad is)

    def vmem_bytes(tm_, tk_, tn_):
        # 2x for double-buffered input/output blocks + f32 accumulator scratch.
        blocks = tm_ * tk_ + tk_ * tn_ + tn_ + tm_ * tn_
        return 2 * itemsize * blocks + 4 * tm_ * tn_

    # Keep tk as large as possible (fewer f32 accumulator RMW passes):
    # shrink tn first, then tm, then tk only as a last resort.
    while vmem_bytes(tm, tk, tn) > budget and tn > _LANE:
        tn = max(_LANE, (tn // 2) // _LANE * _LANE)
    while vmem_bytes(tm, tk, tn) > budget and tm > sublane:
        tm = max(sublane, (tm // 2) // sublane * sublane)
    while vmem_bytes(tm, tk, tn) > budget and tk > _LANE:
        tk = max(_LANE, (tk // 2) // _LANE * _LANE)

    # v7x has 2 TensorCores: make sure the parallel (M, N) grid has >= 2 steps
    # when the problem allows it, so both cores get work. Harmless on v5e/v6e.
    if pl.cdiv(m_pad, tm) * pl.cdiv(n_pad, tn) == 1:
        if n_pad >= 2 * _LANE:
            tn = _round_up(pl.cdiv(n_pad, 2), _LANE)
        elif m_pad >= 2 * sublane:
            tm = _round_up(pl.cdiv(m_pad, 2), sublane)
    return tm, tk, tn


def fc_init(weight, bias, *, dtype=None):
    """One-time parameter prep.

    weight: (N, K) float32 (torch layout: out_features x in_features)
    bias:   (N,)   float32
    dtype:  optional operand dtype (e.g. jnp.bfloat16) for MXU-throughput /
            HBM-traffic wins; accumulation stays f32 in-kernel.

    Transpose + lane padding is done ONCE here, not per forward call.
    """
    n, k = weight.shape
    k_pad = _round_up(k, _LANE)
    n_pad = _round_up(n, _LANE)
    w_t = jnp.pad(weight.T, ((0, k_pad - k), (0, n_pad - n)))   # (K_pad, N_pad)
    b2 = jnp.pad(bias.reshape(1, n), ((0, 0), (0, n_pad - n)))  # (1, N_pad)
    if dtype is not None:
        w_t = w_t.astype(dtype)
        b2 = b2.astype(dtype)
    return {"w_t": w_t, "b2": b2, "n": n, "k": k}


@functools.partial(jax.jit, static_argnames=("n", "k"))
def _fc_forward_2d(x, w_t, b2, *, n, k):
    m = x.shape[0]
    k_pad, n_pad = w_t.shape
    sublane = _sublane(x.dtype)
    m_pad = _round_up(max(m, 1), sublane)

    # Pad only when needed: zero K-padding keeps the math exact (extra K
    # contributes 0), extra M rows / N cols are sliced off below.  Aligned
    # production shapes pay nothing.
    pad_m, pad_k = m_pad - m, k_pad - k
    x_p = x if (pad_m == 0 and pad_k == 0) else jnp.pad(x, ((0, pad_m), (0, pad_k)))

    budget, vmem_limit = _vmem_budget_and_limit()
    itemsize = x.dtype.itemsize
    tm, tk, tn = _pick_tiles(m_pad, k_pad, n_pad, itemsize, sublane, budget)
    gm = pl.cdiv(m_pad, tm)
    gn = pl.cdiv(n_pad, tn)
    gk = pl.cdiv(k_pad, tk)

    # Advisory cost estimate so XLA schedules/overlaps this call sensibly
    # relative to the surrounding pad/slice ops.
    cost = pl.CostEstimate(
        flops=2 * m_pad * n_pad * k_pad,
        transcendentals=0,
        bytes_accessed=itemsize * (
            m_pad * k_pad * gn       # x re-streamed once per N tile
            + k_pad * n_pad * gm     # W re-streamed once per M tile
            + n_pad                  # bias
            + m_pad * n_pad          # output
        ),
    )

    if gk == 1:
        # Whole K fits in one tile: no accumulator scratch, simpler kernel.
        out = pl.pallas_call(
            _fc_kernel_single_k,
            out_shape=jax.ShapeDtypeStruct((m_pad, n_pad), x.dtype),
            grid_spec=pltpu.PrefetchScalarGridSpec(
                num_scalar_prefetch=0,
                grid=(gm, gn),
                in_specs=[
                    pl.BlockSpec((tm, k_pad), lambda i, j: (i, 0)),   # x tile
                    pl.BlockSpec((k_pad, tn), lambda i, j: (0, j)),   # W^T tile
                    pl.BlockSpec((1, tn), lambda i, j: (0, j)),       # bias row
                ],
                out_specs=pl.BlockSpec((tm, tn), lambda i, j: (i, j)),
            ),
            compiler_params=pltpu.CompilerParams(
                dimension_semantics=("parallel", "parallel"),
                vmem_limit_bytes=vmem_limit,
            ),
            cost_estimate=cost,
        )(x_p, w_t, b2)
    else:
        out = pl.pallas_call(
            _fc_kernel_acc,
            out_shape=jax.ShapeDtypeStruct((m_pad, n_pad), x.dtype),
            grid_spec=pltpu.PrefetchScalarGridSpec(
                num_scalar_prefetch=0,
                grid=(gm, gn, gk),
                in_specs=[
                    pl.BlockSpec((tm, tk), lambda i, j, kk: (i, kk)),  # x tile
                    pl.BlockSpec((tk, tn), lambda i, j, kk: (kk, j)),  # W^T tile
                    pl.BlockSpec((1, tn), lambda i, j, kk: (0, j)),    # bias row
                ],
                out_specs=pl.BlockSpec((tm, tn), lambda i, j, kk: (i, j)),
                scratch_shapes=[pltpu.VMEM((tm, tn), jnp.float32)],
            ),
            compiler_params=pltpu.CompilerParams(
                dimension_semantics=("parallel", "parallel", "arbitrary"),
                vmem_limit_bytes=vmem_limit,
            ),
            cost_estimate=cost,
        )(x_p, w_t, b2)
    return out[:m, :n]


def fc_forward(x, params):
    """Equivalent of torch.nn.Linear: accepts x of shape (..., in_features)."""
    k = params["k"]
    n = params["n"]
    w_t = params["w_t"]
    lead = x.shape[:-1]
    x2 = x.reshape((-1, k))
    if x2.dtype != w_t.dtype:
        x2 = x2.astype(w_t.dtype)
    y2 = _fc_forward_2d(x2, w_t, params["b2"], n=n, k=k)
    return y2.reshape(lead + (n,))


if __name__ == "__main__":
    # Fc(input=32, output=16), batch of 8 vectors.
    in_features = 32
    out_features = 16
    batch = 8

    key = jax.random.PRNGKey(0)
    kx, kw, kb = jax.random.split(key, 3)

    x = jax.random.normal(kx, (batch, in_features), dtype=jnp.float32)
    # Deterministic "init" mimicking torch.nn.Linear's uniform(-1/sqrt(in), 1/sqrt(in)).
    bound = 1.0 / (in_features ** 0.5)
    weight = jax.random.uniform(kw, (out_features, in_features),
                                minval=-bound, maxval=bound, dtype=jnp.float32)
    bias = jax.random.uniform(kb, (out_features,),
                              minval=-bound, maxval=bound, dtype=jnp.float32)

    params = fc_init(weight, bias)          # transpose/pad once, not per call
    y = fc_forward(x, params)
    y = jax.block_until_ready(y)

    # Reference check against plain JAX (== torch.nn.Linear semantics).
    y_ref = x @ weight.T + bias
    assert y.shape == (batch, out_features)
    assert jnp.allclose(y, y_ref, atol=1e-5, rtol=1e-5), float(
        jnp.max(jnp.abs(y - y_ref)))

    print("KERNEL_OK")
</pallas_src>

<mosaic_0001>
module attributes {stable_mosaic.version = 11 : i64} {
  func.func @_fc_kernel_single_k(%arg0: i32, %arg1: i32, %arg2: memref<8x128xf32, #tpu.memory_space<vmem>>, %arg3: memref<128x128xf32, #tpu.memory_space<vmem>>, %arg4: memref<1x128xf32, #tpu.memory_space<vmem>>, %arg5: memref<8x128xf32, #tpu.memory_space<vmem>>) attributes {dimension_semantics = [#tpu.dimension_semantics<parallel>, #tpu.dimension_semantics<parallel>], iteration_bounds = array<i64: 1, 1>, scalar_prefetch = 0 : i64, scratch_operands = 0 : i64, tpu.core_type = #tpu.core_type<tc>, window_params = [{transform_indices = @transform_0, window_bounds = array<i64: 8, 128>}, {transform_indices = @transform_1, window_bounds = array<i64: 128, 128>}, {transform_indices = @transform_2, window_bounds = array<i64: 1, 128>}, {transform_indices = @transform_3, window_bounds = array<i64: 8, 128>}]} {
    %c0 = arith.constant 0 : index
    %c0_0 = arith.constant 0 : index
    %0 = vector.load %arg2[%c0, %c0_0] : memref<8x128xf32, #tpu.memory_space<vmem>>, vector<8x128xf32>
    %c0_1 = arith.constant 0 : index
    %c0_2 = arith.constant 0 : index
    %1 = vector.load %arg3[%c0_1, %c0_2] : memref<128x128xf32, #tpu.memory_space<vmem>>, vector<128x128xf32>
    %cst = arith.constant dense<0.000000e+00> : vector<8x128xf32>
    %2 = tpu.matmul %0, %1, %cst {dimension_numbers = #tpu.dot_dimension_numbers<[1], [0], [0], [1], [0, 0, 1, 1], [], []>} : vector<8x128xf32>, vector<128x128xf32>, vector<8x128xf32> -> vector<8x128xf32>
    %c0_3 = arith.constant 0 : index
    %c0_4 = arith.constant 0 : index
    %3 = vector.load %arg4[%c0_3, %c0_4] : memref<1x128xf32, #tpu.memory_space<vmem>>, vector<1x128xf32>
    %4 = vector.broadcast %3 : vector<1x128xf32> to vector<8x128xf32>
    %5 = arith.addf %2, %4 : vector<8x128xf32>
    %c0_5 = arith.constant 0 : index
    %c0_6 = arith.constant 0 : index
    %6 = vector.load %arg5[%c0_5, %c0_6] : memref<8x128xf32, #tpu.memory_space<vmem>>, vector<8x128xf32>
    tpu.vector_store %arg5[%c0_5, %c0_6], %5 {strides = array<i32>} : memref<8x128xf32, #tpu.memory_space<vmem>>, vector<8x128xf32>,
    return
  }
  func.func @transform_0(%arg0: i32, %arg1: i32) -> (i32, i32) {
    %c0_i32 = arith.constant 0 : i32
    %c0_i32_0 = arith.constant 0 : i32
    return %arg0, %c0_i32 : i32, i32
  }
  func.func @transform_1(%arg0: i32, %arg1: i32) -> (i32, i32) {
    %c0_i32 = arith.constant 0 : i32
    %c0_i32_0 = arith.constant 0 : i32
    return %c0_i32, %arg1 : i32, i32
  }
  func.func @transform_2(%arg0: i32, %arg1: i32) -> (i32, i32) {
    %c0_i32 = arith.constant 0 : i32
    %c0_i32_0 = arith.constant 0 : i32
    return %c0_i32, %arg1 : i32, i32
  }
  func.func @transform_3(%arg0: i32, %arg1: i32) -> (i32, i32) {
    %c0_i32 = arith.constant 0 : i32
    return %arg0, %arg1 : i32, i32
  }
}

</mosaic_0001>

<bundles_post_ra>
// kernel: _fc_forward_2d.1
= control target key start
LH: loop header
LB: loop body
LE: loop exit
PB: predicated region body
PF: predicated region fallthrough
CT: control target
= control target key end

     0   :  { %8 = vsyncpa [#allocation3], 0  ;;  %s183_s0 = inlined_call_operand.vmem [shape: f32[8,128], index: 0, kind: input, shape index: {}]   ;;  %s184_s1 = inlined_call_operand.hbm [shape: f32[128,128], index: 1, kind: input, shape index: {}]   ;;  %s185_s2 = inlined_call_operand.vmem [shape: f32[1,128], index: 2, kind: input, shape index: {}]   ;;  %s186_s3 = inlined_call_operand.hbm [shape: f32[8,128], index: 3, kind: output, shape index: {}]  }
   0x1   :  { %9 = vsyncpa [#allocation4], 0  ;;  %s16_s14 = sshll.u32 %s184_s1, 4  ;;  %s147_s15 = smov [#allocation2]   ;;  %s17_s14 = int_to_ptr.hbm [resolvable:$true] %s16_s14 }
   0x2   :  { %s18_s16 = sshll.u32 %s147_s15, 4  ;;  %s148_s17 = smov 128   ;;  %s19_s16 = int_to_ptr.vmem [resolvable:$true] %s18_s16 }
   0x3   :  { %s149_s18 = smov 8  }
   0x4   :  { %24 = dma.hbm_to_vmem [thread:$0]  %s17_s14, 2048, %s19_s16, [#allocation3], %s148_s17, %s148_s17, %s149_s18  }
   0x5   :  { %143 = dma.done.wait [#allocation3], 2048  }
   0x6   :  { %144 = vsyncadd [#allocation3], 4294965248  ;;  %v47_v0 = vld [vmem:[#allocation2 + $0x78] sm:$0xff]  ;;  %v46_v1 = vld [vmem:[#allocation2 + $0x70] sm:$0xff]  ;;  %s150_s22 = smov [#allocation5]   ;;  %s80_s26 = sshll.u32 %s186_s3, 4  ;;  %s81_s26 = int_to_ptr.hbm [resolvable:$true] %s80_s26 }
   0x7   :  { %52 = vmatpush.msra.mxu0 %v47_v0  ;;  %v45_v2 = vld [vmem:[#allocation2 + $0x68] sm:$0xff]  ;;  %v44_v3 = vld [vmem:[#allocation2 + $0x60] sm:$0xff]  ;;  %v43_v4 = vld [vmem:[#allocation2 + $0x58] sm:$0xff]  ;;  %s78_s23 = sshll.u32 %s150_s22, 4  ;;  %s79_s23 = int_to_ptr.vmem [resolvable:$true] %s78_s23 }
   0x8   :  { %v42_v5 = vld [vmem:[#allocation2 + $0x50] sm:$0xff]  ;;  %v41_v6 = vld [vmem:[#allocation2 + $0x48] sm:$0xff]  ;;  %v40_v7 = vld [vmem:[#allocation2 + $0x40] sm:$0xff] }
   0x9   :  { %53 = vmatpush.msra.mxu0 %v46_v1  ;;  %v39_v8 = vld [vmem:[#allocation2 + $0x38] sm:$0xff]  ;;  %v38_v9 = vld [vmem:[#allocation2 + $0x30] sm:$0xff]  ;;  %v37_v10 = vld [vmem:[#allocation2 + $0x28] sm:$0xff] }
   0xa   :  { %v36_v11 = vld [vmem:[#allocation2 + $0x20] sm:$0xff]  ;;  %v35_v12 = vld [vmem:[#allocation2 + $0x18] sm:$0xff]  ;;  %v34_v13 = vld [vmem:[#allocation2 + $0x10] sm:$0xff] }
   0xb   :  { %54 = vmatpush.msra.mxu0 %v45_v2  ;;  %v33_v14 = vld [vmem:[#allocation2 + $0x8] sm:$0xff]  ;;  %v32_v15 = vld [vmem:[#allocation2] sm:$0xff] }
   0xc   :  { %v31_v16 = vld [vmem:[%s183_s0] sm:$0xff] }
   0xd   :  { %55 = vmatpush.msra.mxu0 %v44_v3  ;;  %v94_v17 = vld [vmem:[%s185_s2] ss:$0 sm:$0xff] }
   0xf   :  { %56 = vmatpush.msra.mxu0 %v43_v4 }
  0x11   :  { %57 = vmatpush.msra.mxu0 %v42_v5 }
  0x13   :  { %58 = vmatpush.msra.mxu0 %v41_v6 }
  0x15   :  { %59 = vmatpush.msra.mxu0 %v40_v7 }
  0x17   :  { %60 = vmatpush.msra.mxu0 %v39_v8 }
  0x19   :  { %61 = vmatpush.msra.mxu0 %v38_v9 }
  0x1b   :  { %62 = vmatpush.msra.mxu0 %v37_v10 }
  0x1d   :  { %63 = vmatpush.msra.mxu0 %v36_v11 }
  0x1f   :  { %64 = vmatpush.msra.mxu0 %v35_v12 }
  0x21   :  { %65 = vmatpush.msra.mxu0 %v34_v13 }
  0x23   :  { %66 = vmatpush.msra.mxu0 %v33_v14 }
  0x25   :  { %67 = vmatpush.msra.mxu0 %v32_v15 }
  0x26   :  { %68 = vmatmul.f32.vlgmr.msra.gmra.mxu0 %v31_v16 }
  0xa3   :  { %v69_v18 = vpop.f32.mrf.mxu0 }
  0xa4   :  { %v70_v19 = vadd.f32 %v94_v17, %v69_v18 }
  0xa6   :  { %72 = vst [vmem:[#allocation5] sm:$0xff] %v70_v19 }
  0xa7   :  { %83 = dma.vmem_to_hbm [thread:$0]  %s79_s23, 128, %s81_s26, [#allocation4]  }
  0xa8   :  { %145 = dma.done.wait [#allocation4], 128  }
  0xa9   :  { %146 = vsyncadd [#allocation4], 4294967168 }
  0xaa   :  { %88 = vsyncpa [#allocation3], 1 }
  0xab   :  { %89 = vsyncpa [#allocation4], 1 }

</bundles_post_ra>
